<compile_context>
chip_gen: v6e
topology: v6e:2x2x1
jax: 0.10.0
libtpu: 0.0.40
codegen_flags: <defaults>
</compile_context>

<pallas_src>
import functools

import numpy as np
import jax
import jax.numpy as jnp
from jax.experimental import pallas as pl
from jax.experimental.pallas import tpu as pltpu

CLINICAL_DIM = 10
HIDDEN_DIM = 32
OUTPUT_DIM = 16
BN_EPS = 1e-5
NORM_EPS = 1e-6

PARAM_ROWS = 8                      # packed slab: rows = [b1', b2', s2, t2, pad...]
DEFAULT_TILE_B = 8192               # max batch tile (multiple of 128); sweepable
_TILE_BUCKETS = (128, 512, 2048, 8192)


def clinical_integrator_kernel(x_ref, w1_ref, w2_ref, slab_ref, out_ref):
    """One batch tile in natural row-major (batch, feature) layout.

    x_ref:    (TILE_B, CLINICAL_DIM)      raw input rows (normalization pre-folded)
    w1_ref:   (CLINICAL_DIM, HIDDEN_DIM)  folded W1'
    w2_ref:   (HIDDEN_DIM, OUTPUT_DIM)    folded W2'
    slab_ref: (PARAM_ROWS, HIDDEN_DIM)    row0=b1', row1=b2', row2=s2, row3=t2
    out_ref:  (TILE_B, OUTPUT_DIM)
    """
    b1 = slab_ref[0:1, :]                          # (1, 32)
    b2 = slab_ref[1:2, :OUTPUT_DIM]                # (1, 16)
    s2 = slab_ref[2:3, :OUTPUT_DIM]                # (1, 16)
    t2 = slab_ref[3:4, :OUTPUT_DIM]                # (1, 16)

    # Linear(10->32) [input normalization pre-folded] + ReLU
    h = jnp.dot(x_ref[...], w1_ref[...], preferred_element_type=jnp.float32) + b1
    h = jnp.maximum(h, 0.0)

    # Dropout(0.3) is identity in eval; eval-mode BN1 is pre-folded into W2'/b2'.
    # TODO(synk): training-mode dropout / batch-statistic BN not implemented (eval only).

    # Linear(32->16) + ReLU
    o = jnp.dot(h, w2_ref[...], preferred_element_type=jnp.float32) + b2
    o = jnp.maximum(o, 0.0)

    # BatchNorm1d(16) eval mode, reduced to a single FMA.
    out_ref[...] = (o * s2 + t2).astype(out_ref.dtype)


def fold_params(p):
    """Fold input normalization + both eval-mode BatchNorms into the Linears."""
    inv_std = 1.0 / (p["feature_stds"] + NORM_EPS)                      # (1, 10)
    w1f = p["w1"] * inv_std.reshape(CLINICAL_DIM, 1)                    # (10, 32)
    b1f = p["b1"] - (p["feature_means"] * inv_std) @ p["w1"]            # (1, 32)

    s1 = p["bn1_gamma"] * jax.lax.rsqrt(p["bn1_var"] + BN_EPS)          # (1, 32)
    t1 = p["bn1_beta"] - p["bn1_mean"] * s1                             # (1, 32)
    w2f = p["w2"] * s1.reshape(HIDDEN_DIM, 1)                           # (32, 16)
    b2f = p["b2"] + t1 @ p["w2"]                                        # (1, 16)

    s2 = p["bn2_gamma"] * jax.lax.rsqrt(p["bn2_var"] + BN_EPS)          # (1, 16)
    t2 = p["bn2_beta"] - p["bn2_mean"] * s2                             # (1, 16)

    slab = jnp.zeros((PARAM_ROWS, HIDDEN_DIM), jnp.float32)
    slab = slab.at[0, :].set(b1f.reshape(-1))
    slab = slab.at[1, :OUTPUT_DIM].set(b2f.reshape(-1))
    slab = slab.at[2, :OUTPUT_DIM].set(s2.reshape(-1))
    slab = slab.at[3, :OUTPUT_DIM].set(t2.reshape(-1))
    return w1f, w2f, slab


def _round_up(n, m):
    return ((n + m - 1) // m) * m


def _choose_tile(B, max_tile):
    """Bucketed batch tile (static): big enough to amortize per-step overhead,
    small enough to double-buffer in VMEM, and >=2 grid steps for v7x megacore
    when the batch is large."""
    tile = max_tile
    for t in _TILE_BUCKETS:
        if B <= t:
            tile = t
            break
    tile = min(tile, max_tile)
    # v7x has 2 TensorCores: for large batches guarantee >= 2 "parallel" grid
    # steps, while keeping each tile >= 2048 rows so per-step overhead stays
    # amortized.  (No-op effect on v5e/v6e which have 1 TC.)
    if B > 4096 and pl.cdiv(B, tile) < 2:
        tile = max(2048, _round_up(pl.cdiv(B, 2), 128))
    return tile


@functools.partial(jax.jit, static_argnames=("tile_b",))
def clinical_integrator_forward(x, params, tile_b=DEFAULT_TILE_B):
    """x: (B, 10) float32; params: dict of un-folded module arrays. Returns (B, 16)."""
    B = x.shape[0]
    w1f, w2f, slab = fold_params(params)

    tile = _choose_tile(B, tile_b)
    grid = (pl.cdiv(B, tile),)          # no host padding; last block overhang is masked

    out = pl.pallas_call(
        clinical_integrator_kernel,
        out_shape=jax.ShapeDtypeStruct((B, OUTPUT_DIM), jnp.float32),
        grid=grid,
        in_specs=[
            pl.BlockSpec((tile, CLINICAL_DIM), lambda i: (i, 0)),
            pl.BlockSpec((CLINICAL_DIM, HIDDEN_DIM), lambda i: (0, 0)),
            pl.BlockSpec((HIDDEN_DIM, OUTPUT_DIM), lambda i: (0, 0)),
            pl.BlockSpec((PARAM_ROWS, HIDDEN_DIM), lambda i: (0, 0)),
        ],
        out_specs=pl.BlockSpec((tile, OUTPUT_DIM), lambda i: (i, 0)),
        compiler_params=pltpu.CompilerParams(
            dimension_semantics=("parallel",),      # batch tiles across TCs (v7x)
            vmem_limit_bytes=48 * 1024 * 1024,
        ),
    )(x, w1f, w2f, slab)

    return out


def encode_clinical_dict(d):
    """Python glue matching ClinicalDataIntegrator.forward feature construction."""
    return [
        d.get("age", 60) / 100.0,
        float(d.get("sex", 0)),
        float(np.log1p(d.get("cea_level", 5.0)) / 10.0),
        d.get("time_to_metastasis", 12) / 60.0,
        d.get("num_metastases", 1) / 10.0,
        d.get("primary_t_stage", 3) / 4.0,
        d.get("primary_n_stage", 1) / 3.0,
        float(d.get("synchronous", 0)),
        float(d.get("prior_chemo", 0)),
        float(d.get("liver_only", 1)),
    ]


def init_params(key):
    ks = jax.random.split(key, 16)
    # Linear weights stored as (in, out) == PyTorch weight.T
    w1 = jax.random.normal(ks[0], (CLINICAL_DIM, HIDDEN_DIM), jnp.float32) * 0.1
    b1 = jax.random.normal(ks[1], (1, HIDDEN_DIM), jnp.float32) * 0.01
    w2 = jax.random.normal(ks[2], (HIDDEN_DIM, OUTPUT_DIM), jnp.float32) * 0.1
    b2 = jax.random.normal(ks[3], (1, OUTPUT_DIM), jnp.float32) * 0.01
    return {
        # registered buffers (randomized here so the host-side folding is exercised)
        "feature_means": 0.1 * jax.random.normal(ks[4], (1, CLINICAL_DIM), jnp.float32),
        "feature_stds": 1.0 + jax.random.uniform(ks[5], (1, CLINICAL_DIM), jnp.float32, 0.0, 0.5),
        "w1": w1, "b1": b1,
        "bn1_gamma": 1.0 + 0.1 * jax.random.normal(ks[6], (1, HIDDEN_DIM), jnp.float32),
        "bn1_beta": 0.1 * jax.random.normal(ks[7], (1, HIDDEN_DIM), jnp.float32),
        "bn1_mean": 0.1 * jax.random.normal(ks[8], (1, HIDDEN_DIM), jnp.float32),
        "bn1_var": 1.0 + jax.random.uniform(ks[9], (1, HIDDEN_DIM), jnp.float32, 0.0, 0.5),
        "w2": w2, "b2": b2,
        "bn2_gamma": 1.0 + 0.1 * jax.random.normal(ks[10], (1, OUTPUT_DIM), jnp.float32),
        "bn2_beta": 0.1 * jax.random.normal(ks[11], (1, OUTPUT_DIM), jnp.float32),
        "bn2_mean": 0.1 * jax.random.normal(ks[12], (1, OUTPUT_DIM), jnp.float32),
        "bn2_var": 1.0 + jax.random.uniform(ks[13], (1, OUTPUT_DIM), jnp.float32, 0.0, 0.5),
    }


def reference_forward(x, p):
    """Pure-JAX reference using the ORIGINAL (un-folded) parameters."""
    xn = (x - p["feature_means"]) / (p["feature_stds"] + NORM_EPS)
    h = jnp.maximum(xn @ p["w1"] + p["b1"], 0.0)
    h = (h - p["bn1_mean"]) / jnp.sqrt(p["bn1_var"] + BN_EPS) * p["bn1_gamma"] + p["bn1_beta"]
    o = jnp.maximum(h @ p["w2"] + p["b2"], 0.0)
    o = (o - p["bn2_mean"]) / jnp.sqrt(p["bn2_var"] + BN_EPS) * p["bn2_gamma"] + p["bn2_beta"]
    return o


if __name__ == "__main__":
    key = jax.random.PRNGKey(0)
    pkey, dkey = jax.random.split(key)
    params = init_params(pkey)

    # --- Small deterministic batch of clinical-data dicts (B = 4) ----------
    rng = np.random.default_rng(0)
    batch_dicts = []
    for _ in range(4):
        batch_dicts.append({
            "age": float(rng.uniform(40, 80)),
            "sex": float(rng.integers(0, 2)),
            "cea_level": float(rng.uniform(1.0, 50.0)),
            "time_to_metastasis": float(rng.uniform(0, 48)),
            "num_metastases": float(rng.integers(1, 6)),
            "primary_t_stage": float(rng.integers(1, 5)),
            "primary_n_stage": float(rng.integers(0, 3)),
            "synchronous": float(rng.integers(0, 2)),
            "prior_chemo": float(rng.integers(0, 2)),
            "liver_only": float(rng.integers(0, 2)),
        })
    x_small = jnp.asarray([encode_clinical_dict(d) for d in batch_dicts], dtype=jnp.float32)

    out_small = jax.block_until_ready(clinical_integrator_forward(x_small, params))
    ref_small = jax.block_until_ready(reference_forward(x_small, params))
    assert out_small.shape == (4, OUTPUT_DIM)
    np.testing.assert_allclose(np.asarray(out_small), np.asarray(ref_small),
                               atol=1e-4, rtol=1e-4)

    # --- Multi-tile / ragged-last-block path (B = 300, tile_b=128 -> grid=3) -
    x_big = jax.random.uniform(dkey, (300, CLINICAL_DIM), jnp.float32, 0.0, 1.0)
    out_big = jax.block_until_ready(clinical_integrator_forward(x_big, params, tile_b=128))
    ref_big = jax.block_until_ready(reference_forward(x_big, params))
    assert out_big.shape == (300, OUTPUT_DIM)
    np.testing.assert_allclose(np.asarray(out_big), np.asarray(ref_big),
                               atol=1e-4, rtol=1e-4)

    print("KERNEL_OK")
</pallas_src>

<mosaic_0001>
module attributes {stable_mosaic.version = 11 : i64} {
  func.func @clinical_integrator_kernel(%arg0: i32, %arg1: memref<128x10xf32, #tpu.memory_space<vmem>>, %arg2: memref<10x32xf32, #tpu.memory_space<vmem>>, %arg3: memref<32x16xf32, #tpu.memory_space<vmem>>, %arg4: memref<8x32xf32, #tpu.memory_space<vmem>>, %arg5: memref<128x16xf32, #tpu.memory_space<vmem>>) attributes {dimension_semantics = [#tpu.dimension_semantics<parallel>], iteration_bounds = array<i64: 1>, scalar_prefetch = 0 : i64, scratch_operands = 0 : i64, tpu.core_type = #tpu.core_type<tc>, window_params = [{transform_indices = @transform_0, window_bounds = array<i64: 128, 10>}, {pipeline_mode = #tpu.pipeline_mode<synchronous>, transform_indices = @transform_1, window_bounds = array<i64: 10, 32>}, {pipeline_mode = #tpu.pipeline_mode<synchronous>, transform_indices = @transform_2, window_bounds = array<i64: 32, 16>}, {pipeline_mode = #tpu.pipeline_mode<synchronous>, transform_indices = @transform_3, window_bounds = array<i64: 8, 32>}, {transform_indices = @transform_4, window_bounds = array<i64: 128, 16>}]} {
    %c0 = arith.constant 0 : index
    %c0_0 = arith.constant 0 : index
    %0 = vector.load %arg4[%c0, %c0_0] : memref<8x32xf32, #tpu.memory_space<vmem>>, vector<1x32xf32>
    %c1 = arith.constant 1 : index
    %c0_1 = arith.constant 0 : index
    %1 = vector.load %arg4[%c1, %c0_1] : memref<8x32xf32, #tpu.memory_space<vmem>>, vector<1x16xf32>
    %c2 = arith.constant 2 : index
    %c0_2 = arith.constant 0 : index
    %2 = vector.load %arg4[%c2, %c0_2] : memref<8x32xf32, #tpu.memory_space<vmem>>, vector<1x16xf32>
    %c3 = arith.constant 3 : index
    %c0_3 = arith.constant 0 : index
    %3 = vector.load %arg4[%c3, %c0_3] : memref<8x32xf32, #tpu.memory_space<vmem>>, vector<1x16xf32>
    %c0_4 = arith.constant 0 : index
    %c0_5 = arith.constant 0 : index
    %4 = vector.load %arg1[%c0_4, %c0_5] : memref<128x10xf32, #tpu.memory_space<vmem>>, vector<128x10xf32>
    %c0_6 = arith.constant 0 : index
    %c0_7 = arith.constant 0 : index
    %5 = vector.load %arg2[%c0_6, %c0_7] : memref<10x32xf32, #tpu.memory_space<vmem>>, vector<10x32xf32>
    %cst = arith.constant dense<0.000000e+00> : vector<128x32xf32>
    %6 = tpu.matmul %4, %5, %cst {dimension_numbers = #tpu.dot_dimension_numbers<[1], [0], [0], [1], [0, 0, 1, 1], [], []>} : vector<128x10xf32>, vector<10x32xf32>, vector<128x32xf32> -> vector<128x32xf32>
    %7 = vector.broadcast %0 : vector<1x32xf32> to vector<128x32xf32>
    %8 = arith.addf %6, %7 : vector<128x32xf32>
    %cst_8 = arith.constant 0.000000e+00 : f32
    %9 = vector.broadcast %cst_8 : f32 to vector<128x32xf32>
    %10 = arith.maximumf %8, %9 : vector<128x32xf32>
    %c0_9 = arith.constant 0 : index
    %c0_10 = arith.constant 0 : index
    %11 = vector.load %arg3[%c0_9, %c0_10] : memref<32x16xf32, #tpu.memory_space<vmem>>, vector<32x16xf32>
    %cst_11 = arith.constant dense<0.000000e+00> : vector<128x16xf32>
    %12 = tpu.matmul %10, %11, %cst_11 {dimension_numbers = #tpu.dot_dimension_numbers<[1], [0], [0], [1], [0, 0, 1, 1], [], []>} : vector<128x32xf32>, vector<32x16xf32>, vector<128x16xf32> -> vector<128x16xf32>
    %13 = vector.broadcast %1 : vector<1x16xf32> to vector<128x16xf32>
    %14 = arith.addf %12, %13 : vector<128x16xf32>
    %cst_12 = arith.constant 0.000000e+00 : f32
    %15 = vector.broadcast %cst_12 : f32 to vector<128x16xf32>
    %16 = arith.maximumf %14, %15 : vector<128x16xf32>
    %17 = vector.broadcast %2 : vector<1x16xf32> to vector<128x16xf32>
    %18 = arith.mulf %16, %17 : vector<128x16xf32>
    %19 = vector.broadcast %3 : vector<1x16xf32> to vector<128x16xf32>
    %20 = arith.addf %18, %19 : vector<128x16xf32>
    %c0_13 = arith.constant 0 : index
    %c0_14 = arith.constant 0 : index
    %21 = vector.load %arg5[%c0_13, %c0_14] : memref<128x16xf32, #tpu.memory_space<vmem>>, vector<128x16xf32>
    tpu.vector_store %arg5[%c0_13, %c0_14], %20 {strides = array<i32>} : memref<128x16xf32, #tpu.memory_space<vmem>>, vector<128x16xf32>,
    return
  }
  func.func @transform_0(%arg0: i32) -> (i32, i32) {
    %c0_i32 = arith.constant 0 : i32
    %c0_i32_0 = arith.constant 0 : i32
    return %arg0, %c0_i32 : i32, i32
  }
  func.func @transform_1(%arg0: i32) -> (i32, i32) {
    %c0_i32 = arith.constant 0 : i32
    %c0_i32_0 = arith.constant 0 : i32
    %c0_i32_1 = arith.constant 0 : i32
    return %c0_i32, %c0_i32_0 : i32, i32
  }
  func.func @transform_2(%arg0: i32) -> (i32, i32) {
    %c0_i32 = arith.constant 0 : i32
    %c0_i32_0 = arith.constant 0 : i32
    %c0_i32_1 = arith.constant 0 : i32
    return %c0_i32, %c0_i32_0 : i32, i32
  }
  func.func @transform_3(%arg0: i32) -> (i32, i32) {
    %c0_i32 = arith.constant 0 : i32
    %c0_i32_0 = arith.constant 0 : i32
    %c0_i32_1 = arith.constant 0 : i32
    return %c0_i32, %c0_i32_0 : i32, i32
  }
  func.func @transform_4(%arg0: i32) -> (i32, i32) {
    %c0_i32 = arith.constant 0 : i32
    %c0_i32_0 = arith.constant 0 : i32
    return %arg0, %c0_i32 : i32, i32
  }
}

</mosaic_0001>

<bundles_post_ra>
// kernel: clinical_integrator_forward.1
= control target key start
LH: loop header
LB: loop body
LE: loop exit
PB: predicated region body
PF: predicated region fallthrough
CT: control target
= control target key end

     0   :  { %9 = vsyncpa [#allocation3], 0  ;;  %vm93_vm0 = vcmask 1041408   ;;  %vm44_vm1 = vcmask 80896   ;;  %vm266_vm2 = vcmask 261120   ;;  %vm516_vm3 = vcmask 130048   ;;  %s920_s0 = inlined_call_operand.vmem [shape: f32[4,10], index: 0, kind: input, shape index: {}]   ;;  %s921_s1 = inlined_call_operand.vmem [shape: f32[10,32], index: 1, kind: input, shape index: {}]   ;;  %s922_s2 = inlined_call_operand.vmem [shape: f32[32,16], index: 2, kind: input, shape index: {}]   ;;  %s923_s3 = inlined_call_operand.vmem [shape: f32[8,32], index: 3, kind: input, shape index: {}]   ;;  %s924_s4 = inlined_call_operand.hbm [shape: f32[4,16], index: 4, kind: output, shape index: {}]  }
   0x1   :  { %v39_v0 = vld [vmem:[%s921_s1 + $0x8] sm:$0x3]  ;;  %v38_v1 = vld [vmem:[%s921_s1] sm:$0xff]  ;;  %v24_v4 = vld [vmem:[%s920_s0 + $0x10] sm:$0xff] }
   0x2   :  { %624 = vmatprep.subr.msk.mxu0 %vm93_vm0, %v39_v0  ;;  %v22_v2 = vld [vmem:[%s920_s0] sm:$0xff]  ;;  %v23_v3 = vld [vmem:[%s920_s0 + $0x8] sm:$0xff]  ;;  %v25_v5 = vld [vmem:[%s920_s0 + $0x18] sm:$0xff] }
   0x3   :  { %625 = vmatpush3.msk.msra.mxu0 %vm93_vm0, %v39_v0  ;;  %628 = vmatprep.mubr.msk.f32.mxu0 %vm44_vm1, %v22_v2  ;;  %v26_v6 = vld [vmem:[%s920_s0 + $0x20] sm:$0xff]  ;;  %v27_v7 = vld [vmem:[%s920_s0 + $0x28] sm:$0xff]  ;;  %v28_v8 = vld [vmem:[%s920_s0 + $0x30] sm:$0xff] }
   0x4   :  { %626 = vmatprep.subr.mxu0 %v38_v1  ;;  %v29_v9 = vld [vmem:[%s920_s0 + $0x38] sm:$0xff]  ;;  %v30_v10 = vld [vmem:[%s920_s0 + $0x40] sm:$0xff]  ;;  %v31_v11 = vld [vmem:[%s920_s0 + $0x48] sm:$0xff] }
   0x5   :  { %627 = vmatpush3.msra.mxu0 %v38_v1  ;;  %v32_v12 = vld [vmem:[%s920_s0 + $0x50] sm:$0xff]  ;;  %v33_v13 = vld [vmem:[%s920_s0 + $0x58] sm:$0xff]  ;;  %v34_v14 = vld [vmem:[%s920_s0 + $0x60] sm:$0xff] }
   0x6   :  { %629 = vmatmul.mubr.msk.f32.vlgmr.msra.gmra.mxu0 %vm44_vm1, %v23_v3  ;;  %v35_v15 = vld [vmem:[%s920_s0 + $0x68] sm:$0xff]  ;;  %v36_v16 = vld [vmem:[%s920_s0 + $0x70] sm:$0xff]  ;;  %v37_v17 = vld [vmem:[%s920_s0 + $0x78] sm:$0xff] }
   0x7   :  { %631 = vmatprep.mubr.msk.f32.mxu0 %vm44_vm1, %v24_v4  ;;  %v261_v18 = vld [vmem:[%s922_s2 + $0x18] sm:$0xff]  ;;  %v260_v19 = vld [vmem:[%s922_s2 + $0x10] sm:$0xff]  ;;  %v259_v20 = vld [vmem:[%s922_s2 + $0x8] sm:$0xff] }
   0x8   :  { %652 = vmatprep.subr.mxu1 %v261_v18  ;;  %v258_v21 = vld [vmem:[%s922_s2] sm:$0xff] }
   0x9   :  { %653 = vmatpush3.msra.mxu1 %v261_v18  ;;  %v549_v22 = vld [vmem:[%s923_s3] ss:$0 sm:$0xff] }
   0xa   :  { %632 = vmatmul.mubr.msk.f32.gmra.mxu0 %vm44_vm1, %v25_v5  ;;  %654 = vmatprep.subr.mxu1 %v260_v19 }
   0xb   :  { %634 = vmatprep.mubr.msk.f32.mxu0 %vm44_vm1, %v26_v6  ;;  %655 = vmatpush3.msra.mxu1 %v260_v19 }
   0xc   :  { %656 = vmatprep.subr.mxu1 %v259_v20 }
   0xd   :  { %657 = vmatpush3.msra.mxu1 %v259_v20 }
   0xe   :  { %635 = vmatmul.mubr.msk.f32.gmra.mxu0 %vm44_vm1, %v27_v7  ;;  %658 = vmatprep.subr.mxu1 %v258_v21  ;;  %v841_v7 = vld [vmem:[%s923_s3 + $0x1] ss:$0 sm:$0xff] }
   0xf   :  { %637 = vmatprep.mubr.msk.f32.mxu0 %vm44_vm1, %v28_v8  ;;  %659 = vmatpush3.msra.mxu1 %v258_v21 }
  0x12   :  { %638 = vmatmul.mubr.msk.f32.gmra.mxu0 %vm44_vm1, %v29_v9 }
  0x13   :  { %640 = vmatprep.mubr.msk.f32.mxu0 %vm44_vm1, %v30_v10  ;;  %v847_v10 = vld [vmem:[%s923_s3 + $0x2] ss:$0 sm:$0xff] }
  0x16   :  { %641 = vmatmul.mubr.msk.f32.gmra.mxu0 %vm44_vm1, %v31_v11 }
  0x17   :  { %643 = vmatprep.mubr.msk.f32.mxu0 %vm44_vm1, %v32_v12 }
  0x1a   :  { %644 = vmatmul.mubr.msk.f32.gmra.mxu0 %vm44_vm1, %v33_v13 }
  0x1b   :  { %646 = vmatprep.mubr.msk.f32.mxu0 %vm44_vm1, %v34_v14  ;;  %v853_v14 = vld [vmem:[%s923_s3 + $0x3] ss:$0 sm:$0xff] }
  0x1e   :  { %647 = vmatmul.mubr.msk.f32.gmra.mxu0 %vm44_vm1, %v35_v15 }
  0x1f   :  { %649 = vmatprep.mubr.msk.f32.mxu0 %vm44_vm1, %v36_v16 }
  0x22   :  { %650 = vmatmul.mubr.msk.f32.gmra.mxu0 %vm44_vm1, %v37_v17 }
  0xc6   :  { %v630_v23 = vpop.f32.mrf.mxu0 }
  0xc7   :  { %v169_v24 = vadd.f32 %v630_v23, %v549_v22 }
  0xc8   :  { %v163_v25 = vpop.f32.mrf.mxu0 }
  0xc9   :  { %v164_v26 = vadd.f32 %v549_v22, %v163_v25  ;;  %v243_v29 = vmax.f32 %v169_v24, 0.0 }
  0xca   :  { %v633_v27 = vpop.f32.mrf.mxu0 }
  0xcb   :  { %v242_v28 = vmax.f32 %v164_v26, 0.0  ;;  %v179_v30 = vadd.f32 %v633_v27, %v549_v22 }
  0xcc   :  { %v173_v31 = vpop.f32.mrf.mxu0 }
  0xcd   :  { %v174_v32 = vadd.f32 %v549_v22, %v173_v31  ;;  %660 = vmatprep.mubr.msk.f32.mxu1 %vm266_vm2, %v242_v28  ;;  %v245_v35 = vmax.f32 %v179_v30, 0.0 }
  0xce   :  { %v636_v33 = vpop.f32.mrf.mxu0  ;;  %661 = vmatmul.mubr.msk.f32.vlgmr.msra.gmra.mxu1 %vm266_vm2, %v243_v29 }
  0xcf   :  { %v244_v34 = vmax.f32 %v174_v32, 0.0  ;;  %v189_v36 = vadd.f32 %v636_v33, %v549_v22 }
  0xd0   :  { %v183_v37 = vpop.f32.mrf.mxu0 }
  0xd1   :  { %v184_v38 = vadd.f32 %v549_v22, %v183_v37  ;;  %663 = vmatprep.mubr.msk.f32.mxu1 %vm266_vm2, %v244_v34  ;;  %v247_v41 = vmax.f32 %v189_v36, 0.0 }
  0xd2   :  { %v639_v39 = vpop.f32.mrf.mxu0  ;;  %664 = vmatmul.mubr.msk.f32.gmra.mxu1 %vm266_vm2, %v245_v35 }
  0xd3   :  { %v246_v40 = vmax.f32 %v184_v38, 0.0  ;;  %v199_v42 = vadd.f32 %v639_v39, %v549_v22 }
  0xd4   :  { %v193_v43 = vpop.f32.mrf.mxu0 }
  0xd5   :  { %v194_v44 = vadd.f32 %v549_v22, %v193_v43  ;;  %666 = vmatprep.mubr.msk.f32.mxu1 %vm266_vm2, %v246_v40  ;;  %v249_v47 = vmax.f32 %v199_v42, 0.0 }
  0xd6   :  { %v642_v45 = vpop.f32.mrf.mxu0  ;;  %667 = vmatmul.mubr.msk.f32.gmra.mxu1 %vm266_vm2, %v247_v41 }
  0xd7   :  { %v248_v46 = vmax.f32 %v194_v44, 0.0  ;;  %v209_v48 = vadd.f32 %v642_v45, %v549_v22 }
  0xd8   :  { %v203_v49 = vpop.f32.mrf.mxu0 }
  0xd9   :  { %v204_v50 = vadd.f32 %v549_v22, %v203_v49  ;;  %669 = vmatprep.mubr.msk.f32.mxu1 %vm266_vm2, %v248_v46  ;;  %v251_v53 = vmax.f32 %v209_v48, 0.0 }
  0xda   :  { %v645_v51 = vpop.f32.mrf.mxu0  ;;  %670 = vmatmul.mubr.msk.f32.gmra.mxu1 %vm266_vm2, %v249_v47 }
  0xdb   :  { %v250_v52 = vmax.f32 %v204_v50, 0.0  ;;  %v219_v54 = vadd.f32 %v645_v51, %v549_v22 }
  0xdc   :  { %v213_v55 = vpop.f32.mrf.mxu0 }
  0xdd   :  { %v214_v56 = vadd.f32 %v549_v22, %v213_v55  ;;  %672 = vmatprep.mubr.msk.f32.mxu1 %vm266_vm2, %v250_v52  ;;  %v253_v59 = vmax.f32 %v219_v54, 0.0 }
  0xde   :  { %v648_v57 = vpop.f32.mrf.mxu0  ;;  %673 = vmatmul.mubr.msk.f32.gmra.mxu1 %vm266_vm2, %v251_v53 }
  0xdf   :  { %v252_v58 = vmax.f32 %v214_v56, 0.0  ;;  %v229_v60 = vadd.f32 %v648_v57, %v549_v22 }
  0xe0   :  { %v223_v61 = vpop.f32.mrf.mxu0 }
  0xe1   :  { %v224_v62 = vadd.f32 %v549_v22, %v223_v61  ;;  %675 = vmatprep.mubr.msk.f32.mxu1 %vm266_vm2, %v252_v58  ;;  %v255_v1 = vmax.f32 %v229_v60, 0.0 }
  0xe2   :  { %v651_v63 = vpop.f32.mrf.mxu0  ;;  %676 = vmatmul.mubr.msk.f32.gmra.mxu1 %vm266_vm2, %v253_v59 }
  0xe3   :  { %v254_v0 = vmax.f32 %v224_v62, 0.0  ;;  %v239_v2 = vadd.f32 %v651_v63, %v549_v22 }
  0xe4   :  { %v233_v3 = vpop.f32.mrf.mxu0 }
  0xe5   :  { %v234_v4 = vadd.f32 %v549_v22, %v233_v3  ;;  %678 = vmatprep.mubr.msk.f32.mxu1 %vm266_vm2, %v254_v0  ;;  %v257_v6 = vmax.f32 %v239_v2, 0.0 }
  0xe6   :  { %679 = vmatmul.mubr.msk.f32.gmra.mxu1 %vm266_vm2, %v255_v1 }
  0xe7   :  { %v256_v5 = vmax.f32 %v234_v4, 0.0 }
  0xe9   :  { %681 = vmatprep.mubr.msk.f32.mxu1 %vm266_vm2, %v256_v5 }
  0xea   :  { %682 = vmatmul.mubr.msk.f32.gmra.mxu1 %vm266_vm2, %v257_v6 }
 0x18e   :  { %v662_v8 = vpop.f32.mrf.mxu1 }
 0x18f   :  { %v387_v9 = vadd.f32 %v662_v8, %v841_v7 }
 0x190   :  { %v381_v11 = vpop.f32.mrf.mxu1 }
 0x191   :  { %v461_v12 = vmax.f32 %v387_v9, 0.0  ;;  %v382_v13 = vadd.f32 %v841_v7, %v381_v11 }
 0x192   :  { %v665_v15 = vpop.f32.mrf.mxu1 }
 0x193   :  { %v481_v16 = vmul.f32 %v847_v10, %v461_v12  ;;  %v460_v17 = vmax.f32 %v382_v13, 0.0  ;;  %v397_v18 = vadd.f32 %v665_v15, %v841_v7 }
 0x194   :  { %v391_v19 = vpop.f32.mrf.mxu1 }
 0x195   :  { %v501_v20 = vadd.f32 %v853_v14, %v481_v16  ;;  %v480_v21 = vmul.f32 %v847_v10, %v460_v17  ;;  %v463_v22 = vmax.f32 %v397_v18, 0.0  ;;  %v392_v23 = vadd.f32 %v841_v7, %v391_v19 }
 0x196   :  { %v668_v24 = vpop.f32.mrf.mxu1 }
 0x197   :  { %518 = vst.msk [vmem:[#allocation2 + $0x8] sm:$0xff] %vm516_vm3, %v501_v20  ;;  %v500_v25 = vadd.f32 %v853_v14, %v480_v21  ;;  %v483_v26 = vmul.f32 %v847_v10, %v463_v22  ;;  %v462_v27 = vmax.f32 %v392_v23, 0.0  ;;  %v407_v28 = vadd.f32 %v668_v24, %v841_v7 }
 0x198   :  { %v401_v29 = vpop.f32.mrf.mxu1 }
 0x199   :  { %517 = vst.msk [vmem:[#allocation2] sm:$0xff] %vm516_vm3, %v500_v25  ;;  %v503_v30 = vadd.f32 %v853_v14, %v483_v26  ;;  %v482_v31 = vmul.f32 %v847_v10, %v462_v27  ;;  %v465_v32 = vmax.f32 %v407_v28, 0.0  ;;  %v402_v33 = vadd.f32 %v841_v7, %v401_v29 }
 0x19a   :  { %v671_v34 = vpop.f32.mrf.mxu1 }
 0x19b   :  { %520 = vst.msk [vmem:[#allocation2 + $0x18] sm:$0xff] %vm516_vm3, %v503_v30  ;;  %v502_v35 = vadd.f32 %v853_v14, %v482_v31  ;;  %v485_v36 = vmul.f32 %v847_v10, %v465_v32  ;;  %v464_v37 = vmax.f32 %v402_v33, 0.0  ;;  %v417_v38 = vadd.f32 %v671_v34, %v841_v7 }
 0x19c   :  { %v411_v39 = vpop.f32.mrf.mxu1 }
 0x19d   :  { %519 = vst.msk [vmem:[#allocation2 + $0x10] sm:$0xff] %vm516_vm3, %v502_v35  ;;  %v505_v40 = vadd.f32 %v853_v14, %v485_v36  ;;  %v484_v41 = vmul.f32 %v847_v10, %v464_v37  ;;  %v467_v42 = vmax.f32 %v417_v38, 0.0  ;;  %v412_v43 = vadd.f32 %v841_v7, %v411_v39 }
 0x19e   :  { %v674_v44 = vpop.f32.mrf.mxu1 }
 0x19f   :  { %522 = vst.msk [vmem:[#allocation2 + $0x28] sm:$0xff] %vm516_vm3, %v505_v40  ;;  %v504_v45 = vadd.f32 %v853_v14, %v484_v41  ;;  %v487_v46 = vmul.f32 %v847_v10, %v467_v42  ;;  %v466_v47 = vmax.f32 %v412_v43, 0.0  ;;  %v427_v48 = vadd.f32 %v674_v44, %v841_v7 }
 0x1a0   :  { %v421_v49 = vpop.f32.mrf.mxu1 }
 0x1a1   :  { %521 = vst.msk [vmem:[#allocation2 + $0x20] sm:$0xff] %vm516_vm3, %v504_v45  ;;  %v507_v50 = vadd.f32 %v853_v14, %v487_v46  ;;  %v486_v51 = vmul.f32 %v847_v10, %v466_v47  ;;  %v469_v52 = vmax.f32 %v427_v48, 0.0  ;;  %v422_v53 = vadd.f32 %v841_v7, %v421_v49 }
 0x1a2   :  { %v677_v54 = vpop.f32.mrf.mxu1 }
 0x1a3   :  { %524 = vst.msk [vmem:[#allocation2 + $0x38] sm:$0xff] %vm516_vm3, %v507_v50  ;;  %v506_v55 = vadd.f32 %v853_v14, %v486_v51  ;;  %v489_v56 = vmul.f32 %v847_v10, %v469_v52  ;;  %v468_v57 = vmax.f32 %v422_v53, 0.0  ;;  %v437_v58 = vadd.f32 %v677_v54, %v841_v7 }
 0x1a4   :  { %v431_v59 = vpop.f32.mrf.mxu1 }
 0x1a5   :  { %523 = vst.msk [vmem:[#allocation2 + $0x30] sm:$0xff] %vm516_vm3, %v506_v55  ;;  %v509_v60 = vadd.f32 %v853_v14, %v489_v56  ;;  %v488_v61 = vmul.f32 %v847_v10, %v468_v57  ;;  %v471_v62 = vmax.f32 %v437_v58, 0.0  ;;  %v432_v63 = vadd.f32 %v841_v7, %v431_v59 }
 0x1a6   :  { %v680_v0 = vpop.f32.mrf.mxu1 }
 0x1a7   :  { %526 = vst.msk [vmem:[#allocation2 + $0x48] sm:$0xff] %vm516_vm3, %v509_v60  ;;  %v508_v1 = vadd.f32 %v853_v14, %v488_v61  ;;  %v491_v2 = vmul.f32 %v847_v10, %v471_v62  ;;  %v470_v3 = vmax.f32 %v432_v63, 0.0  ;;  %v447_v4 = vadd.f32 %v680_v0, %v841_v7 }
 0x1a8   :  { %v441_v5 = vpop.f32.mrf.mxu1 }
 0x1a9   :  { %525 = vst.msk [vmem:[#allocation2 + $0x40] sm:$0xff] %vm516_vm3, %v508_v1  ;;  %v511_v6 = vadd.f32 %v853_v14, %v491_v2  ;;  %v490_v8 = vmul.f32 %v847_v10, %v470_v3  ;;  %v473_v9 = vmax.f32 %v447_v4, 0.0  ;;  %v442_v11 = vadd.f32 %v841_v7, %v441_v5 }
 0x1aa   :  { %v683_v12 = vpop.f32.mrf.mxu1 }
 0x1ab   :  { %528 = vst.msk [vmem:[#allocation2 + $0x58] sm:$0xff] %vm516_vm3, %v511_v6  ;;  %v510_v13 = vadd.f32 %v853_v14, %v490_v8  ;;  %v493_v15 = vmul.f32 %v847_v10, %v473_v9  ;;  %v472_v16 = vmax.f32 %v442_v11, 0.0  ;;  %v457_v17 = vadd.f32 %v683_v12, %v841_v7 }
 0x1ac   :  { %v451_v18 = vpop.f32.mrf.mxu1 }
 0x1ad   :  { %527 = vst.msk [vmem:[#allocation2 + $0x50] sm:$0xff] %vm516_vm3, %v510_v13  ;;  %v513_v19 = vadd.f32 %v853_v14, %v493_v15  ;;  %v492_v20 = vmul.f32 %v847_v10, %v472_v16  ;;  %v475_v21 = vmax.f32 %v457_v17, 0.0  ;;  %v452_v22 = vadd.f32 %v841_v7, %v451_v18 }
 0x1af   :  { %530 = vst.msk [vmem:[#allocation2 + $0x68] sm:$0xff] %vm516_vm3, %v513_v19  ;;  %v512_v23 = vadd.f32 %v853_v14, %v492_v20  ;;  %v495_v24 = vmul.f32 %v847_v10, %v475_v21  ;;  %v474_v25 = vmax.f32 %v452_v22, 0.0 }
 0x1b1   :  { %529 = vst.msk [vmem:[#allocation2 + $0x60] sm:$0xff] %vm516_vm3, %v512_v23  ;;  %v515_v26 = vadd.f32 %v853_v14, %v495_v24  ;;  %v494_v27 = vmul.f32 %v847_v10, %v474_v25 }
 0x1b3   :  { %532 = vst.msk [vmem:[#allocation2 + $0x78] sm:$0xff] %vm516_vm3, %v515_v26  ;;  %v514_v28 = vadd.f32 %v853_v14, %v494_v27 }
 0x1b5   :  { %531 = vst.msk [vmem:[#allocation2 + $0x70] sm:$0xff] %vm516_vm3, %v514_v28 }
 0x1b6   :  { %537 = vsyncadd [#allocation3], 1984  ;;  %s709_s3 = smov [#allocation2]  }
 0x1b7   :  { %s538_s11 = sshll.u32 %s709_s3, 4  ;;  %s539_s11 = int_to_ptr.vmem [resolvable:$true] %s538_s11 }
 0x1b8   :  { %s687_s12 = scalar_lea.vmem %s539_s11, 64  ;;  %s691_s13 = scalar_lea.vmem %s539_s11, 2048 }
 0x1b9   :  { %p688_p0 = scmp.ne.s32.totalorder %s539_s11, %s687_s12  ;;  %p692_p1 = scmp.lt.s32.totalorder %s539_s11, %s539_s11 }
 0x1ba   :  { %p693_p2 = scmp.lt.s32.totalorder %s691_s13, %s687_s12 }
 0x1bc   :  { %p694_p3 = por %p693_p2, %p692_p1 }
 0x1be   :  { %p695_p4 = pnand %p694_p3, %p688_p0 }
 0x1c0   :  { %698 = shalt.err (!%p695_p4)
}
 0x1c1   :  { %s710_s14 = smov 64   ;;  %s711_s15 = smov 4  }
 0x1c2   :  { %544 = dma.vmem_to_hbm [thread:$0]  %s539_s11, 64, %s924_s4, [#allocation3], %s710_s14, %s710_s14, %s711_s15  }
 0x1c3   :  { %707 = dma.done.wait [#allocation3], 2048  }
 0x1c4   :  { %708 = vsyncadd [#allocation3], 4294965248 }
 0x1c5   :  { %548 = vsyncpa [#allocation3], 1 }

</bundles_post_ra>
